<compile_context>
chip_gen: v5e
topology: v5e:2x2
jax: 0.10.0
libtpu: 0.0.40
codegen_flags: <defaults>
</compile_context>

<pallas_src>
import jax
import jax.numpy as jnp
from jax import lax
from jax.experimental import pallas as pl
from jax.experimental.pallas import tpu as pltpu

# --- module hyperparameters (deterministic, from AdaptiveWingLoss.__init__) ---
ALPHA = 2.1
OMEGA = 14.0
THETA = 0.5
EPSILON = 1.0
TMP = THETA / EPSILON            # 0.5
_NEG_LN2 = -0.6931471805599453   # ln(TMP) = ln(0.5) = -ln 2

# whetherWeighted=False by default -> grayDilation / weight-map path unused.
# TODO(synk): grayDilation-weighted branch (whetherWeighted=True) not implemented.

_LANES = 128
_SUBLANES = 8


def _round_up(x, m):
    return ((x + m - 1) // m) * m


def _cdiv(a, b):
    return (a + b - 1) // b


def _num_tensorcores():
    """2 on v7x-class chips (2 TensorCores/chip), else 1. Perf-only decision."""
    try:
        kind = jax.devices()[0].device_kind.lower()
    except Exception:
        return 1
    return 2 if ("v7" in kind or "7x" in kind) else 1


def _make_kernel(chunk_rows, n_chunks, red_axis):
    """Build the per-tile kernel.

    Each grid step owns a (tile_rows, 128) block of both inputs; it is consumed
    in `n_chunks` chunks of (chunk_rows, 128) so elementwise temporaries stay
    small. Partial sums accumulate into a resident (8, 128) output block with
    pure VPU vreg adds; the cross-lane reduce + mean happen in the wrapper.
    """

    def kernel(pred_ref, tgt_ref, out_ref):
        @pl.when(pl.program_id(red_axis) == 0)
        def _init():
            out_ref[...] = jnp.zeros_like(out_ref)

        def chunk_body(c, acc):
            off = pl.multiple_of(c * chunk_rows, 16)
            p = pred_ref[pl.ds(off, chunk_rows), :].astype(jnp.float32)
            t = tgt_ref[pl.ds(off, chunk_rows), :].astype(jnp.float32)

            delta_y = jnp.abs(p - t)
            amy = ALPHA - t                    # alpha - y; > 0 for targets in [0, 1]
            small = delta_y < THETA

            # Select BEFORE the transcendental: one exp covers both
            #   delta_y**amy (small branch, epsilon == 1) and 0.5**amy (large branch).
            # delta_y == 0 -> amy*log(0) = -inf -> exp = 0 exactly (no NaN, amy > 0).
            log_arg = jnp.where(small, amy * jnp.log(delta_y), amy * _NEG_LN2)
            pow_sel = jnp.exp(log_arg)

            one_plus = 1.0 + pow_sel
            # approx=True would add ~1e-4 rel error in `a`; keep exact for the
            # 1e-5 self-test tolerance (review correctness note).
            inv = pl.reciprocal(one_plus, approx=False)
            log1p = jnp.log(one_plus)

            # large branch: a*dy - c == a*(dy - theta) + OMEGA*log(1 + 0.5**amy)
            #   with a = (OMEGA/eps)*amy * 2*0.5**amy / (1 + 0.5**amy)
            # small branch: OMEGA*log(1 + dy**amy)
            # Both share the single OMEGA*log(1 + pow_sel) term.
            a = (2.0 * OMEGA / EPSILON) * amy * pow_sel * inv
            l = OMEGA * log1p + jnp.where(small, 0.0, a * (delta_y - THETA))

            # Fold (chunk_rows, 128) -> (8, 128) with pure vreg adds (VPU only;
            # the reshape is layout-preserving).
            return acc + jnp.sum(l.reshape(-1, _SUBLANES, _LANES), axis=0)

        acc = lax.fori_loop(
            0, n_chunks, chunk_body,
            jnp.zeros((_SUBLANES, _LANES), jnp.float32))
        out_ref[...] += acc

    return kernel


def adaptive_wing_loss(predictions, targets, *, chunk_rows=512, max_chunks_per_tile=16):
    """predictions, targets: [B, C, H, W] float (f32 or bf16). Returns scalar mean loss."""
    assert predictions.shape == targets.shape
    total = int(predictions.size)
    rows_raw = _cdiv(total, _LANES)

    # Chunk / tile sizing. chunk and tile_rows are always multiples of 16 (bf16-safe).
    if rows_raw <= chunk_rows:
        chunk = _round_up(max(rows_raw, 1), 16)
        chunks_per_tile = 1
    else:
        chunk = chunk_rows
        chunks_per_tile = min(max_chunks_per_tile, _cdiv(rows_raw, chunk))
    tile_rows = chunk * chunks_per_tile
    n_tiles = _cdiv(rows_raw, tile_rows)

    # 2-way TensorCore split only on v7x-class chips and only when there is
    # more than one tile; v5e/v6e take the plain 1-D grid.
    num_cores = 2 if (_num_tensorcores() >= 2 and n_tiles >= 2) else 1
    inner = _cdiv(n_tiles, num_cores)
    padded_rows = num_cores * inner * tile_rows
    padded_total = padded_rows * _LANES

    # Flatten to a lane-dense slab; zero-pad the ragged tail (a zero pred/target
    # pair contributes exactly 0 to the loss sum, so no masking is needed).
    p_flat = predictions.reshape(-1)
    t_flat = targets.reshape(-1)
    if padded_total != total:
        p_flat = jnp.pad(p_flat, (0, padded_total - total))
        t_flat = jnp.pad(t_flat, (0, padded_total - total))
    p2 = p_flat.reshape(padded_rows, _LANES)
    t2 = t_flat.reshape(padded_rows, _LANES)

    kernel = _make_kernel(chunk, chunks_per_tile,
                          red_axis=(1 if num_cores == 2 else 0))

    if num_cores == 2:
        grid = (2, inner)
        in_spec = pl.BlockSpec((tile_rows, _LANES), lambda c, i: (c * inner + i, 0))
        out_spec = pl.BlockSpec((None, _SUBLANES, _LANES), lambda c, i: (c, 0, 0))
        out_shape = jax.ShapeDtypeStruct((2, _SUBLANES, _LANES), jnp.float32)
        semantics = (pltpu.CORE_PARALLEL, pltpu.ARBITRARY)
    else:
        grid = (inner,)
        in_spec = pl.BlockSpec((tile_rows, _LANES), lambda i: (i, 0))
        out_spec = pl.BlockSpec((_SUBLANES, _LANES), lambda i: (0, 0))
        out_shape = jax.ShapeDtypeStruct((_SUBLANES, _LANES), jnp.float32)
        semantics = (pltpu.ARBITRARY,)

    partials = pl.pallas_call(
        kernel,
        out_shape=out_shape,
        grid_spec=pltpu.PrefetchScalarGridSpec(
            num_scalar_prefetch=0,
            grid=grid,
            in_specs=[in_spec, in_spec],
            out_specs=out_spec,
        ),
        compiler_params=pltpu.CompilerParams(
            dimension_semantics=semantics,
            vmem_limit_bytes=32 * 1024 * 1024,  # fits v5e/v6e/v7x scoped VMEM
        ),
    )(p2, t2)

    # Final cross-lane reduce + mean over the TRUE element count in the wrapper.
    return (jnp.sum(partials) / total).astype(predictions.dtype)


def _reference(predictions, targets):
    """Pure-JAX reference matching the PyTorch forward exactly."""
    delta_y = jnp.abs(predictions - targets)
    amy = ALPHA - targets
    a = (OMEGA / EPSILON) * amy / (1.0 + jnp.power(TMP, amy)) * jnp.power(TMP, amy - 1.0)
    c = THETA * a - OMEGA * jnp.log(1.0 + jnp.power(TMP, amy))
    l = jnp.where(delta_y < THETA,
                  OMEGA * jnp.log(1.0 + jnp.power(delta_y / EPSILON, amy)),
                  a * delta_y - c)
    return jnp.mean(l)


if __name__ == "__main__":
    key = jax.random.PRNGKey(0)
    kp, kt = jax.random.split(key)
    B, C, H, W = 2, 4, 16, 16  # batchSize, landmarkNum, heatMapSize, heatMapSize
    # heatmap-like values in [0, 1]
    predictions = jax.random.uniform(kp, (B, C, H, W), dtype=jnp.float32)
    targets = jax.random.uniform(kt, (B, C, H, W), dtype=jnp.float32)

    loss = adaptive_wing_loss(predictions, targets)
    jax.block_until_ready(loss)

    ref = _reference(predictions, targets)
    assert jnp.allclose(loss, ref, rtol=1e-5, atol=1e-5), (loss, ref)

    print("KERNEL_OK")
</pallas_src>

<mosaic_0001>
module attributes {stable_mosaic.version = 11 : i64} {
  func.func @kernel(%arg0: i32, %arg1: memref<16x128xf32, #tpu.memory_space<vmem>>, %arg2: memref<16x128xf32, #tpu.memory_space<vmem>>, %arg3: memref<8x128xf32, #tpu.memory_space<vmem>>) attributes {dimension_semantics = [#tpu.dimension_semantics<arbitrary>], iteration_bounds = array<i64: 1>, scalar_prefetch = 0 : i64, scratch_operands = 0 : i64, tpu.core_type = #tpu.core_type<tc>, window_params = [{transform_indices = @transform_0, window_bounds = array<i64: 16, 128>}, {transform_indices = @transform_1, window_bounds = array<i64: 16, 128>}, {pipeline_mode = #tpu.pipeline_mode<synchronous>, transform_indices = @transform_2, window_bounds = array<i64: 8, 128>}]} {
    %c0_i32 = arith.constant 0 : i32
    %0 = arith.cmpi eq, %arg0, %c0_i32 : i32
    %1 = arith.extui %0 : i1 to i32
    %c0_i32_0 = arith.constant 0 : i32
    %2 = arith.cmpi ne, %1, %c0_i32_0 : i32
    scf.if %2 {
      %cst_16 = arith.constant 0.000000e+00 : f32
      %44 = vector.broadcast %cst_16 : f32 to vector<8x128xf32>
      %c0_17 = arith.constant 0 : index
      %c0_18 = arith.constant 0 : index
      %45 = vector.load %arg3[%c0_17, %c0_18] : memref<8x128xf32, #tpu.memory_space<vmem>>, vector<8x128xf32>
      tpu.vector_store %arg3[%c0_17, %c0_18], %44 {strides = array<i32>} : memref<8x128xf32, #tpu.memory_space<vmem>>, vector<8x128xf32>,
    } else {
    }
    %cst = arith.constant 0.000000e+00 : f32
    %3 = vector.broadcast %cst : f32 to vector<8x128xf32>
    %c0_i32_1 = arith.constant 0 : i32
    %c16_i32 = arith.constant 16 : i32
    %4 = arith.muli %c0_i32_1, %c16_i32 : i32
    %5 = tpu.assume_multiple %4, 16 : i32
    %6 = arith.index_cast %5 : i32 to index
    %c0 = arith.constant 0 : index
    %7 = vector.load %arg1[%6, %c0] : memref<16x128xf32, #tpu.memory_space<vmem>>, vector<16x128xf32>
    %8 = arith.index_cast %5 : i32 to index
    %c0_2 = arith.constant 0 : index
    %9 = vector.load %arg2[%8, %c0_2] : memref<16x128xf32, #tpu.memory_space<vmem>>, vector<16x128xf32>
    %10 = arith.subf %7, %9 : vector<16x128xf32>
    %11 = math.absf %10 : vector<16x128xf32>
    %cst_3 = arith.constant 2.100000e+00 : f32
    %12 = vector.broadcast %cst_3 : f32 to vector<16x128xf32>
    %13 = arith.subf %12, %9 : vector<16x128xf32>
    %cst_4 = arith.constant 5.000000e-01 : f32
    %14 = vector.broadcast %cst_4 : f32 to vector<16x128xf32>
    %15 = arith.cmpf olt, %11, %14 : vector<16x128xf32>
    %16 = math.log %11 : vector<16x128xf32>
    %17 = arith.mulf %13, %16 : vector<16x128xf32>
    %cst_5 = arith.constant -0.693147182 : f32
    %18 = vector.broadcast %cst_5 : f32 to vector<16x128xf32>
    %19 = arith.mulf %13, %18 : vector<16x128xf32>
    %20 = arith.select %15, %17, %19 : vector<16x128xi1>, vector<16x128xf32>
    %21 = math.exp %20 : vector<16x128xf32>
    %cst_6 = arith.constant 1.000000e+00 : f32
    %22 = vector.broadcast %cst_6 : f32 to vector<16x128xf32>
    %23 = arith.addf %22, %21 : vector<16x128xf32>
    %24 = tpu.reciprocal %23 : vector<16x128xf32> -> vector<16x128xf32>
    %25 = math.log %23 : vector<16x128xf32>
    %cst_7 = arith.constant 2.800000e+01 : f32
    %26 = vector.broadcast %cst_7 : f32 to vector<16x128xf32>
    %27 = arith.mulf %26, %13 : vector<16x128xf32>
    %28 = arith.mulf %27, %21 : vector<16x128xf32>
    %29 = arith.mulf %28, %24 : vector<16x128xf32>
    %cst_8 = arith.constant 1.400000e+01 : f32
    %30 = vector.broadcast %cst_8 : f32 to vector<16x128xf32>
    %31 = arith.mulf %30, %25 : vector<16x128xf32>
    %cst_9 = arith.constant 5.000000e-01 : f32
    %32 = vector.broadcast %cst_9 : f32 to vector<16x128xf32>
    %33 = arith.subf %11, %32 : vector<16x128xf32>
    %34 = arith.mulf %29, %33 : vector<16x128xf32>
    %cst_10 = arith.constant 0.000000e+00 : f32
    %35 = vector.broadcast %cst_10 : f32 to vector<16x128xf32>
    %36 = arith.select %15, %35, %34 : vector<16x128xi1>, vector<16x128xf32>
    %37 = arith.addf %31, %36 : vector<16x128xf32>
    %38 = vector.shape_cast %37 : vector<16x128xf32> to vector<2x8x128xf32>
    %cst_11 = arith.constant dense<0.000000e+00> : vector<8x128xf32>
    %39 = vector.multi_reduction <add>, %38, %cst_11 [0] : vector<2x8x128xf32> to vector<8x128xf32>
    %40 = arith.addf %3, %39 : vector<8x128xf32>
    %c1_i32 = arith.constant 1 : i32
    %c0_12 = arith.constant 0 : index
    %c0_13 = arith.constant 0 : index
    %41 = vector.load %arg3[%c0_12, %c0_13] : memref<8x128xf32, #tpu.memory_space<vmem>>, vector<8x128xf32>
    %42 = arith.addf %41, %40 : vector<8x128xf32>
    %c0_14 = arith.constant 0 : index
    %c0_15 = arith.constant 0 : index
    %43 = vector.load %arg3[%c0_14, %c0_15] : memref<8x128xf32, #tpu.memory_space<vmem>>, vector<8x128xf32>
    tpu.vector_store %arg3[%c0_14, %c0_15], %42 {strides = array<i32>} : memref<8x128xf32, #tpu.memory_space<vmem>>, vector<8x128xf32>,
    return
  }
  func.func @transform_0(%arg0: i32) -> (i32, i32) {
    %c0_i32 = arith.constant 0 : i32
    %c0_i32_0 = arith.constant 0 : i32
    return %arg0, %c0_i32 : i32, i32
  }
  func.func @transform_1(%arg0: i32) -> (i32, i32) {
    %c0_i32 = arith.constant 0 : i32
    %c0_i32_0 = arith.constant 0 : i32
    return %arg0, %c0_i32 : i32, i32
  }
  func.func @transform_2(%arg0: i32) -> (i32, i32) {
    %c0_i32 = arith.constant 0 : i32
    %c0_i32_0 = arith.constant 0 : i32
    %c0_i32_1 = arith.constant 0 : i32
    return %c0_i32, %c0_i32_0 : i32, i32
  }
}

</mosaic_0001>

<bundles_post_ra>
// kernel: tpu_custom_call.1
= control target key start
LH: loop header
LB: loop body
LE: loop exit
PB: predicated region body
PF: predicated region fallthrough
CT: control target
= control target key end

     0   :  { %7 = vsyncpa [#allocation3], 0  ;;  %s304_s0 = inlined_call_operand.hbm [shape: f32[16,128], index: 0, kind: input, shape index: {}]   ;;  %s305_s1 = inlined_call_operand.hbm [shape: f32[16,128], index: 1, kind: input, shape index: {}]   ;;  %s306_s2 = inlined_call_operand.hbm [shape: f32[8,128], index: 2, kind: output, shape index: {}]  }
   0x1   :  { %8 = vsyncpa [#allocation6], 0 }
   0x2   :  { %9 = vsyncpa [#allocation4], 0  ;;  %s14_s11 = sshll.u32 %s304_s0, 4  ;;  %s250_s12 = smov [#allocation2]   ;;  %s15_s11 = int_to_ptr.hbm [resolvable:$true] %s14_s11 }
   0x3   :  { %s16_s13 = sshll.u32 %s250_s12, 4  ;;  %s27_s16 = sshll.u32 %s305_s1, 4  ;;  %s17_s13 = int_to_ptr.vmem [resolvable:$true] %s16_s13  ;;  %s28_s16 = int_to_ptr.hbm [resolvable:$true] %s27_s16 }
   0x4   :  { %s251_s17 = smov 128   ;;  %s252_s18 = smov 8  }
   0x5   :  { %22 = dma.hbm_to_vmem [thread:$0]  %s15_s11, 256, %s17_s13, [#allocation3], %s251_s17, %s251_s17, %s252_s18  }
   0x6   :  { %s253_s19 = smov [#allocation5]  }
   0x7   :  { %s29_s20 = sshll.u32 %s253_s19, 4  ;;  %s30_s20 = int_to_ptr.vmem [resolvable:$true] %s29_s20 }
   0x8   :  { %35 = dma.hbm_to_vmem [thread:$0]  %s28_s16, 256, %s30_s20, [#allocation6], %s251_s17, %s251_s17, %s252_s18  }
   0x9   :  { %244 = dma.done.wait [#allocation3], 256  }
   0xa   :  { %245 = vsyncadd [#allocation3], 4294967040 }
   0xb   :  { %246 = dma.done.wait [#allocation6], 256  }
   0xc   :  { %247 = vsyncadd [#allocation6], 4294967040  ;;  %v49_v0 = vld [vmem:[#allocation2] sm:$0xff]  ;;  %v50_v1 = vld [vmem:[#allocation2 + $0x8] sm:$0xff]  ;;  %s254_s0 = smov [#allocation7]   ;;  %s137_s23 = sshll.u32 %s306_s2, 4  ;;  %s138_s23 = int_to_ptr.hbm [resolvable:$true] %s137_s23 }
   0xd   :  { %v51_v2 = vld [vmem:[#allocation5] sm:$0xff]  ;;  %v52_v3 = vld [vmem:[#allocation5 + $0x8] sm:$0xff]  ;;  %s135_s1 = sshll.u32 %s254_s0, 4  ;;  %s136_s1 = int_to_ptr.vmem [resolvable:$true] %s135_s1 }
   0xe   :  { %v53_v4 = vsub.f32 %v49_v0, %v51_v2  ;;  %v54_v5 = vsub.f32 %v50_v1, %v52_v3  ;;  %v57_v8 = vsub.f32 2.1, %v51_v2  ;;  %v58_v9 = vsub.f32 2.1, %v52_v3 }
  0x10   :  { %v276_v6 = vand.u32 2147483647, %v53_v4  ;;  %v278_v7 = vand.u32 2147483647, %v54_v5  ;;  %v67_v13 = vmul.f32 -0.6931472, %v57_v8 }
  0x11   :  { %v68_v15 = vmul.f32 -0.6931472, %v58_v9  ;;  %v109_v29 = vmul.f32 28.0, %v57_v8  ;;  %v110_v32 = vmul.f32 28.0, %v58_v9 }
  0x12   :  { %156 = vlog2.f32 %v276_v6  ;;  %vm59_vm0 = vcmp.lt.f32.partialorder %v276_v6, 0.5  ;;  %vm60_vm1 = vcmp.lt.f32.partialorder %v278_v7, 0.5  ;;  %v148_v52 = vadd.f32 -0.5, %v276_v6 }
  0x13   :  { %158 = vlog2.f32 %v278_v7  ;;  %v149_v55 = vadd.f32 -0.5, %v278_v7 }
  0x18   :  { %v157_v10 = vpop.eup %156 }
  0x19   :  { %v159_v11 = vpop.eup %158  ;;  %v62_v12 = vmul.f32 0.6931472, %v157_v10 }
  0x1a   :  { %v64_v14 = vmul.f32 0.6931472, %v159_v11 }
  0x1b   :  { %v65_v16 = vmul.f32 %v62_v12, %v57_v8 }
  0x1c   :  { %v66_v17 = vmul.f32 %v64_v14, %v58_v9 }
  0x1d   :  { %v69_v18 = vsel %vm59_vm0, %v65_v16, %v67_v13 }
  0x1e   :  { %v70_v19 = vsel %vm60_vm1, %v66_v17, %v68_v15  ;;  %v71_v20 = vmul.f32 1.442695, %v69_v18 }
  0x1f   :  { %v73_v21 = vmul.f32 1.442695, %v70_v19 }
  0x20   :  { %160 = vpow2.f32 %v71_v20 }
  0x21   :  { %162 = vpow2.f32 %v73_v21 }
  0x26   :  { %v161_v22 = vpop.eup %160 }
  0x27   :  { %v163_v23 = vpop.eup %162  ;;  %v75_v24 = vadd.f32 1.0, %v161_v22  ;;  %v111_v46 = vmul.f32 %v161_v22, %v109_v29 }
  0x28   :  { %v76_v25 = vadd.f32 1.0, %v163_v23  ;;  %v112_v49 = vmul.f32 %v163_v23, %v110_v32 }
  0x29   :  { %164 = vrcp.f32 %v75_v24  ;;  %vm82_vm2 = vweird.f32 %v75_v24  ;;  %v88_v30 = vand.u32 2147483648, %v75_v24  ;;  %v86_v34 = vand.u32 2147483647, %v75_v24 }
  0x2a   :  { %166 = vrcp.f32 %v76_v25  ;;  %v102_v35 = vand.u32 2147483648, %v76_v25  ;;  %vm96_vm4 = vweird.f32 %v76_v25  ;;  %v100_v37 = vand.u32 2147483647, %v76_v25 }
  0x2b   :  { %168 = vlog2.f32 %v75_v24  ;;  %v89_v42 = vor.u32 1.1754944e-38, %v88_v30  ;;  %vm87_vm7 = vcmp.eq.f32.partialorder %v86_v34, 8.507059e+37 }
  0x2c   :  { %170 = vlog2.f32 %v76_v25  ;;  %v103_v45 = vor.u32 1.1754944e-38, %v102_v35  ;;  %vm101_vm9 = vcmp.eq.f32.partialorder %v100_v37, 8.507059e+37 }
  0x2f   :  { %v165_v26 = vpop.eup %164 }
  0x30   :  { %v167_v27 = vpop.eup %166  ;;  %v78_v28 = vmul.f32 %v165_v26, %v75_v24  ;;  %vm83_vm3 = vweird.f32 %v165_v26 }
  0x31   :  { %v92_v31 = vmul.f32 %v167_v27, %v76_v25  ;;  %vm97_vm5 = vweird.f32 %v167_v27  ;;  %v169_v38 = vpop.eup %168  ;;  %vm289_vm6 = vmor %vm82_vm2, %vm83_vm3 }
  0x32   :  { %v79_v33 = vsub.f32 1.0, %v78_v28  ;;  %v171_v40 = vpop.eup %170  ;;  %vm98_vm8 = vmor %vm96_vm4, %vm97_vm5  ;;  %v106_v48 = vmul.f32 0.6931472, %v169_v38 }
  0x33   :  { %v93_v36 = vsub.f32 1.0, %v92_v31  ;;  %v108_v51 = vmul.f32 0.6931472, %v171_v40 }
  0x34   :  { %v80_v39 = vmul.f32 %v165_v26, %v79_v33  ;;  %v115_v59 = vmul.f32 14.0, %v106_v48 }
  0x35   :  { %v94_v43 = vmul.f32 %v167_v27, %v93_v36  ;;  %v116_v60 = vmul.f32 14.0, %v108_v51 }
  0x36   :  { %v81_v44 = vadd.f32 %v165_v26, %v80_v39 }
  0x37   :  { %v95_v47 = vadd.f32 %v167_v27, %v94_v43 }
  0x38   :  { %v85_v50 = vsel %vm289_vm6, %v165_v26, %v81_v44 }
  0x39   :  { %v90_v53 = vsel %vm87_vm7, %v89_v42, %v85_v50  ;;  %v99_v54 = vsel %vm98_vm8, %v167_v27, %v95_v47 }
  0x3a   :  { %v104_v56 = vsel %vm101_vm9, %v103_v45, %v99_v54  ;;  %v113_v57 = vmul.f32 %v111_v46, %v90_v53 }
  0x3b   :  { %v114_v58 = vmul.f32 %v112_v49, %v104_v56 }
  0x3c   :  { %v119_v61 = vmul.f32 %v148_v52, %v113_v57 }
  0x3d   :  { %v120_v62 = vmul.f32 %v149_v55, %v114_v58 }
  0x3e   :  { %v121_v63 = vsel %vm59_vm0, 0.0, %v119_v61 }
  0x3f   :  { %v122_v0 = vsel %vm60_vm1, 0.0, %v120_v62  ;;  %v123_v1 = vadd.f32 %v121_v63, %v115_v59 }
  0x40   :  { %v124_v2 = vadd.f32 %v122_v0, %v116_v60 }
  0x42   :  { %v125_v3 = vadd.f32 %v124_v2, %v123_v1 }
  0x44   :  { %129 = vst [vmem:[#allocation7] sm:$0xff] %v125_v3 }
  0x45   :  { %140 = dma.vmem_to_hbm [thread:$0]  %s136_s1, 128, %s138_s23, [#allocation4]  }
  0x46   :  { %248 = dma.done.wait [#allocation4], 128  }
  0x47   :  { %249 = vsyncadd [#allocation4], 4294967168 }
  0x48   :  { %145 = vsyncpa [#allocation3], 1 }
  0x49   :  { %146 = vsyncpa [#allocation6], 1 }
  0x4a   :  { %147 = vsyncpa [#allocation4], 1 }

</bundles_post_ra>
